<compile_context>
chip_gen: v5e
topology: v5e:2x2
jax: 0.10.0
libtpu: 0.0.40
codegen_flags: <defaults>
</compile_context>

<pallas_src>
import jax
import jax.numpy as jnp
from jax.experimental import pallas as pl
from jax.experimental.pallas import tpu as pltpu


def _make_kernel(n: int, tile_n: int, tiles_per_core: int):
    """Build the tiled contrastive-loss kernel for static shape parameters."""

    def kernel(za_ref, zb_ref, out_ref, acc_ref):
        c = pl.program_id(0)          # core slice (parallel -> one TC each on v7x)
        i = pl.program_id(1)          # row-tile index within this core's range

        @pl.when(i == 0)
        def _init():
            acc_ref[...] = jnp.zeros_like(acc_ref)

        za = za_ref[...].astype(jnp.float32)            # (tile_n, d)
        zb = zb_ref[...].astype(jnp.float32)            # (tile_n, d)

        # Per-row dot products d_i = <z_a[i], z_b[i]>  -> (tile_n, 1)
        dots = jnp.sum(za * zb, axis=-1, keepdims=True)

        # Global (UNCLAMPED) tile index / row index.  Rows >= n (remainder
        # padding, or the clamped overflow tile of the second core slice)
        # must contribute exactly 0 (exp(0)=1 would otherwise pollute the sum).
        t = c * tiles_per_core + i
        row = t * tile_n + jax.lax.broadcasted_iota(jnp.int32, (tile_n, 1), 0)
        valid = row < n
        is_last_row = row == (n - 1)

        dots = jnp.where(valid, dots, 0.0)
        exp_d = jnp.where(valid, jnp.exp(dots), 0.0)

        # Closed form: (n-3)*d_i + exp(d_i), plus one extra d for row n-1.
        contrib = (jnp.float32(n - 3) * dots + exp_d
                   + jnp.where(is_last_row, dots, 0.0))
        acc_ref[...] += jnp.sum(contrib, keepdims=True)  # (1, 1) VMEM accumulator

        @pl.when(i == tiles_per_core - 1)
        def _finalize():
            # Per-core partial, written to this core's own (1, 8, 128) output
            # block (all elements equal; wrapper reads [c, 0, 0]).
            out_ref[...] = jnp.broadcast_to(acc_ref[...], out_ref.shape)

    return kernel


def contrastive_learning_loss(z_a, z_b, *, tile_n=None, target_block_bytes=None,
                              buffer_depth=2):
    """z_a, z_b: (n, d) arrays. Returns scalar f32 loss (matches PyTorch ref)."""
    assert z_a.shape == z_b.shape and z_a.ndim == 2
    n, d = z_a.shape
    itemsize = jnp.dtype(z_a.dtype).itemsize
    # Minimum sublane tile per dtype: 8 (f32), 16 (bf16), 32 (int8/fp8).
    min_sublane = max(8, 32 // itemsize)

    # ---- chip-aware VMEM budget (v7x: 64 MiB, v5e/v6e: 128 MiB) ----
    try:
        vmem_capacity = int(pltpu.get_tpu_info().vmem_capacity_bytes)
    except Exception:
        vmem_capacity = 64 * 1024 * 1024            # conservative fallback (v7x)
    usable_vmem = max(vmem_capacity - (16 << 20), 16 << 20)

    if target_block_bytes is None:
        # ~8 MiB/input block on v7x (amortize per-step overhead vs 3.2 TB/s HBM);
        # 4 MiB on v5e/v6e is already ~85-90% of their HBM roofline.
        target_block_bytes = (8 << 20) if vmem_capacity <= (64 << 20) else (4 << 20)

    bytes_per_row = max(d * itemsize, 1)
    if tile_n is None:
        tile_n = max(min_sublane, target_block_bytes // bytes_per_row)

    # Clamp tile so 2 inputs x buffer_depth buffers x block (+ headroom) fits VMEM.
    max_block_bytes = max(min_sublane * bytes_per_row,
                          (usable_vmem - (4 << 20)) // (2 * buffer_depth))
    tile_n = min(tile_n, max(min_sublane, max_block_bytes // bytes_per_row))

    if tile_n >= n:
        tile_n = n                                     # single full-array tile
    else:
        tile_n = max(min_sublane, (tile_n // min_sublane) * min_sublane)

    grid_n = pl.cdiv(n, tile_n)

    # ---- megacore split: leading "parallel" core axis (2 TCs on v7x) ----
    num_cores = 2 if grid_n >= 2 else 1
    tiles_per_core = pl.cdiv(grid_n, num_cores)

    block_bytes = tile_n * d * itemsize
    vmem_limit = int(min(usable_vmem,
                         max(2 * buffer_depth * block_bytes + (4 << 20), 16 << 20)))

    # Optional deeper pipelining (only if profiling shows exposed DMA).
    bs_kwargs = ({"pipeline_mode": pl.Buffered(buffer_depth)}
                 if buffer_depth > 2 else {})

    def in_map(c, i):
        # Clamp to the last real tile so the DMA never indexes past the array;
        # the kernel's row mask zeroes any clamped/overflow rows.
        return (jnp.minimum(c * tiles_per_core + i, grid_n - 1), 0)

    out = pl.pallas_call(
        _make_kernel(n, tile_n, tiles_per_core),
        out_shape=jax.ShapeDtypeStruct((num_cores, 8, 128), jnp.float32),
        grid=(num_cores, tiles_per_core),
        in_specs=[
            pl.BlockSpec((tile_n, d), in_map, **bs_kwargs),
            pl.BlockSpec((tile_n, d), in_map, **bs_kwargs),
        ],
        out_specs=pl.BlockSpec((1, 8, 128), lambda c, i: (c, 0, 0)),
        scratch_shapes=[pltpu.VMEM((1, 1), jnp.float32)],
        compiler_params=pltpu.CompilerParams(
            dimension_semantics=("parallel", "arbitrary"),
            vmem_limit_bytes=vmem_limit,
        ),
    )(z_a, z_b)

    # Sum the per-core partials (2 scalars) in plain JAX.
    return jnp.sum(out[:, 0, 0])


def _reference_loss(z_a, z_b):
    # Pure-JAX mirror of the PyTorch code, used as a correctness check.
    n = z_a.shape[0]
    alignment = 0.0
    for i in range(n):
        alignment += -jnp.sum(jnp.dot(z_a[i].T, z_b[i]))
    uniformity_loss = 0.0
    for i in range(n):
        negative_sum = 0.0
        for j in range(n - 1):
            if i == j:
                continue
            negative_sum += jnp.sum(jnp.dot(z_a[i].T, z_b[i]))
        uniformity = jnp.exp(jnp.dot(z_a[i].T, z_b[i]))
        uniformity_loss += negative_sum + uniformity
    return alignment + uniformity_loss


if __name__ == "__main__":
    # Case 1: small shape consistent with the module (8 embeddings of dim 32).
    k_a, k_b = jax.random.split(jax.random.PRNGKey(0))
    n, d = 8, 32
    # Small values so exp() stays well-behaved (mimics normalized embeddings).
    z_a = jax.random.normal(k_a, (n, d), dtype=jnp.float32) * 0.1
    z_b = jax.random.normal(k_b, (n, d), dtype=jnp.float32) * 0.1

    loss = jax.block_until_ready(contrastive_learning_loss(z_a, z_b))
    ref = _reference_loss(z_a, z_b)
    assert jnp.allclose(loss, ref, rtol=1e-5, atol=1e-5), (loss, ref)

    # Case 2: multi-tile + two-core-slice path with a remainder tile
    # (n=20, tile_n=8 -> 3 real tiles -> grid (2, 2): core slice 1 gets one
    #  remainder tile plus one clamped, fully-masked overflow tile).
    k_a2, k_b2 = jax.random.split(jax.random.PRNGKey(1))
    n2, d2 = 20, 128
    z_a2 = jax.random.normal(k_a2, (n2, d2), dtype=jnp.float32) * 0.05
    z_b2 = jax.random.normal(k_b2, (n2, d2), dtype=jnp.float32) * 0.05

    loss2 = jax.block_until_ready(
        contrastive_learning_loss(z_a2, z_b2, tile_n=8))
    ref2 = _reference_loss(z_a2, z_b2)
    assert jnp.allclose(loss2, ref2, rtol=1e-5, atol=1e-5), (loss2, ref2)

    print("KERNEL_OK")
</pallas_src>

<mosaic_0001>
module attributes {stable_mosaic.version = 11 : i64} {
  func.func @kernel(%arg0: i32, %arg1: i32, %arg2: memref<8x32xf32, #tpu.memory_space<vmem>>, %arg3: memref<8x32xf32, #tpu.memory_space<vmem>>, %arg4: memref<1x8x128xf32, #tpu.memory_space<vmem>>, %arg5: memref<1x1xf32, #tpu.memory_space<vmem>>) attributes {dimension_semantics = [#tpu.dimension_semantics<parallel>, #tpu.dimension_semantics<arbitrary>], iteration_bounds = array<i64: 1, 1>, scalar_prefetch = 0 : i64, scratch_operands = 1 : i64, tpu.core_type = #tpu.core_type<tc>, window_params = [{transform_indices = @transform_0, window_bounds = array<i64: 8, 32>}, {transform_indices = @transform_1, window_bounds = array<i64: 8, 32>}, {transform_indices = @transform_2, window_bounds = array<i64: 1, 8, 128>}]} {
    %c0_i32 = arith.constant 0 : i32
    %0 = arith.cmpi eq, %arg1, %c0_i32 : i32
    %1 = arith.extui %0 : i1 to i32
    %c0_i32_0 = arith.constant 0 : i32
    %2 = arith.cmpi ne, %1, %c0_i32_0 : i32
    scf.if %2 {
      %cst_16 = arith.constant 0.000000e+00 : f32
      %40 = vector.broadcast %cst_16 : f32 to vector<1x1xf32>
      %c0_17 = arith.constant 0 : index
      %c0_18 = arith.constant 0 : index
      %41 = vector.load %arg5[%c0_17, %c0_18] : memref<1x1xf32, #tpu.memory_space<vmem>>, vector<1x1xf32>
      tpu.vector_store %arg5[%c0_17, %c0_18], %40 {strides = array<i32>} : memref<1x1xf32, #tpu.memory_space<vmem>>, vector<1x1xf32>,
    } else {
    }
    %c0 = arith.constant 0 : index
    %c0_1 = arith.constant 0 : index
    %3 = vector.load %arg2[%c0, %c0_1] : memref<8x32xf32, #tpu.memory_space<vmem>>, vector<8x32xf32>
    %c0_2 = arith.constant 0 : index
    %c0_3 = arith.constant 0 : index
    %4 = vector.load %arg3[%c0_2, %c0_3] : memref<8x32xf32, #tpu.memory_space<vmem>>, vector<8x32xf32>
    %5 = arith.mulf %3, %4 : vector<8x32xf32>
    %cst = arith.constant dense<0.000000e+00> : vector<8xf32>
    %6 = vector.multi_reduction <add>, %5, %cst [1] : vector<8x32xf32> to vector<8xf32>
    %7 = vector.shape_cast %6 : vector<8xf32> to vector<8x1xf32>
    %c1_i32 = arith.constant 1 : i32
    %8 = arith.muli %arg0, %c1_i32 : i32
    %9 = arith.addi %8, %arg1 : i32
    %c8_i32 = arith.constant 8 : i32
    %10 = arith.muli %9, %c8_i32 : i32
    %11 = tpu.iota {dimensions = array<i32: 0>} : vector<8x1xi32>
    %12 = vector.broadcast %10 : i32 to vector<8x1xi32>
    %13 = arith.addi %12, %11 : vector<8x1xi32>
    %c8_i32_4 = arith.constant 8 : i32
    %14 = vector.broadcast %c8_i32_4 : i32 to vector<8x1xi32>
    %15 = arith.cmpi slt, %13, %14 : vector<8x1xi32>
    %c7_i32 = arith.constant 7 : i32
    %16 = vector.broadcast %c7_i32 : i32 to vector<8x1xi32>
    %17 = arith.cmpi eq, %13, %16 : vector<8x1xi32>
    %cst_5 = arith.constant 0.000000e+00 : f32
    %18 = vector.broadcast %cst_5 : f32 to vector<8x1xf32>
    %19 = arith.select %15, %7, %18 : vector<8x1xi1>, vector<8x1xf32>
    %20 = math.exp %19 : vector<8x1xf32>
    %cst_6 = arith.constant 0.000000e+00 : f32
    %21 = vector.broadcast %cst_6 : f32 to vector<8x1xf32>
    %22 = arith.select %15, %20, %21 : vector<8x1xi1>, vector<8x1xf32>
    %cst_7 = arith.constant 5.000000e+00 : f32
    %23 = vector.broadcast %cst_7 : f32 to vector<8x1xf32>
    %24 = arith.mulf %23, %19 : vector<8x1xf32>
    %25 = arith.addf %24, %22 : vector<8x1xf32>
    %cst_8 = arith.constant 0.000000e+00 : f32
    %26 = vector.broadcast %cst_8 : f32 to vector<8x1xf32>
    %27 = arith.select %17, %19, %26 : vector<8x1xi1>, vector<8x1xf32>
    %28 = arith.addf %25, %27 : vector<8x1xf32>
    %c0_9 = arith.constant 0 : index
    %c0_10 = arith.constant 0 : index
    %29 = vector.load %arg5[%c0_9, %c0_10] : memref<1x1xf32, #tpu.memory_space<vmem>>, vector<1x1xf32>
    %30 = vector.shape_cast %28 : vector<8x1xf32> to vector<1x8x1xf32>
    %cst_11 = arith.constant dense<0.000000e+00> : vector<1xf32>
    %31 = vector.multi_reduction <add>, %30, %cst_11 [1, 2] : vector<1x8x1xf32> to vector<1xf32>
    %32 = vector.shape_cast %31 : vector<1xf32> to vector<1x1x1xf32>
    %33 = vector.extract %32[0, 0, 0] : f32 from vector<1x1x1xf32>
    %34 = vector.broadcast %33 : f32 to vector<1x1xf32>
    %35 = arith.addf %29, %34 : vector<1x1xf32>
    %c0_12 = arith.constant 0 : index
    %c0_13 = arith.constant 0 : index
    %36 = vector.load %arg5[%c0_12, %c0_13] : memref<1x1xf32, #tpu.memory_space<vmem>>, vector<1x1xf32>
    tpu.vector_store %arg5[%c0_12, %c0_13], %35 {strides = array<i32>} : memref<1x1xf32, #tpu.memory_space<vmem>>, vector<1x1xf32>,
    %c0_i32_14 = arith.constant 0 : i32
    %37 = arith.cmpi eq, %arg1, %c0_i32_14 : i32
    %38 = arith.extui %37 : i1 to i32
    %c0_i32_15 = arith.constant 0 : i32
    %39 = arith.cmpi ne, %38, %c0_i32_15 : i32
    scf.if %39 {
      %c0_16 = arith.constant 0 : index
      %c0_17 = arith.constant 0 : index
      %40 = vector.load %arg5[%c0_16, %c0_17] : memref<1x1xf32, #tpu.memory_space<vmem>>, vector<1x1xf32>
      %41 = vector.shape_cast %40 : vector<1x1xf32> to vector<1x1x1xf32>
      %42 = vector.broadcast %41 : vector<1x1x1xf32> to vector<1x8x128xf32>
      %c0_18 = arith.constant 0 : index
      %c0_19 = arith.constant 0 : index
      %c0_20 = arith.constant 0 : index
      %43 = vector.load %arg4[%c0_18, %c0_19, %c0_20] : memref<1x8x128xf32, #tpu.memory_space<vmem>>, vector<1x8x128xf32>
      tpu.vector_store %arg4[%c0_18, %c0_19, %c0_20], %42 {strides = array<i32>} : memref<1x8x128xf32, #tpu.memory_space<vmem>>, vector<1x8x128xf32>,
    } else {
    }
    return
  }
  func.func @transform_0(%arg0: i32, %arg1: i32) -> (i32, i32) {
    %c1_i32 = arith.constant 1 : i32
    %0 = arith.muli %arg0, %c1_i32 : i32
    %1 = arith.addi %0, %arg1 : i32
    %c0_i32 = arith.constant 0 : i32
    %2 = arith.minsi %1, %c0_i32 : i32
    %c0_i32_0 = arith.constant 0 : i32
    %c0_i32_1 = arith.constant 0 : i32
    return %2, %c0_i32_0 : i32, i32
  }
  func.func @transform_1(%arg0: i32, %arg1: i32) -> (i32, i32) {
    %c1_i32 = arith.constant 1 : i32
    %0 = arith.muli %arg0, %c1_i32 : i32
    %1 = arith.addi %0, %arg1 : i32
    %c0_i32 = arith.constant 0 : i32
    %2 = arith.minsi %1, %c0_i32 : i32
    %c0_i32_0 = arith.constant 0 : i32
    %c0_i32_1 = arith.constant 0 : i32
    return %2, %c0_i32_0 : i32, i32
  }
  func.func @transform_2(%arg0: i32, %arg1: i32) -> (i32, i32, i32) {
    %c0_i32 = arith.constant 0 : i32
    %c0_i32_0 = arith.constant 0 : i32
    %c0_i32_1 = arith.constant 0 : i32
    return %arg0, %c0_i32, %c0_i32_0 : i32, i32, i32
  }
}

</mosaic_0001>

<bundles_post_ra>
// kernel: tpu_custom_call.1
= control target key start
LH: loop header
LB: loop body
LE: loop exit
PB: predicated region body
PF: predicated region fallthrough
CT: control target
= control target key end

     0   :  { %7 = vsyncpa [#allocation4], 0  ;;  %s255_s0 = inlined_call_operand.hbm [shape: f32[8,32], index: 0, kind: input, shape index: {}]   ;;  %s256_s1 = inlined_call_operand.hbm [shape: f32[8,32], index: 1, kind: input, shape index: {}]   ;;  %s257_s2 = inlined_call_operand.hbm [shape: f32[1,8,128], index: 2, kind: output, shape index: {}]  }
   0x1   :  { %8 = vsyncpa [#allocation7], 0 }
   0x2   :  { %9 = vsyncpa [#allocation5], 0  ;;  %s20_s11 = sshll.u32 %s255_s0, 4  ;;  %s224_s12 = smov [#allocation3]   ;;  %s21_s11 = int_to_ptr.hbm [resolvable:$true] %s20_s11 }
   0x3   :  { %s22_s13 = sshll.u32 %s224_s12, 4  ;;  %s36_s16 = sshll.u32 %s256_s1, 4  ;;  %s23_s13 = int_to_ptr.vmem [resolvable:$true] %s22_s13  ;;  %s37_s16 = int_to_ptr.hbm [resolvable:$true] %s36_s16 }
   0x4   :  { %25 = dma.hbm_to_vmem [thread:$0]  %s21_s11, 128, %s23_s13, [#allocation4]  }
   0x5   :  { %s225_s17 = smov [#allocation6]  }
   0x6   :  { %s38_s18 = sshll.u32 %s225_s17, 4  ;;  %s39_s18 = int_to_ptr.vmem [resolvable:$true] %s38_s18 }
   0x7   :  { %41 = dma.hbm_to_vmem [thread:$0]  %s37_s16, 128, %s39_s18, [#allocation7]  }
   0x8   :  { %218 = dma.done.wait [#allocation4], 128  }
   0x9   :  { %219 = vsyncadd [#allocation4], 4294967168 }
   0xa   :  { %220 = dma.done.wait [#allocation7], 128  }
   0xb   :  { %221 = vsyncadd [#allocation7], 4294967168  ;;  %v62_v0 = vld [vmem:[#allocation3] sm:$0xff]  ;;  %v63_v1 = vld [vmem:[#allocation6] sm:$0xff]  ;;  %vm65_vm0 = vcmask 261120   ;;  %v71_v5 = vlaneseq  ;;  %vm86_vm2 = vcmask 7168  }
   0xc   :  { %v64_v2 = vmul.f32 %v63_v1, %v62_v0  ;;  %vm60_vm3 = vcmask 0   ;;  %v226_v14 = vmov 0.0   ;;  %v227_v22 = vmov 0   ;;  %s228_s1 = smov [#allocation8]   ;;  %s119_s22 = sshll.u32 %s257_s2, 4  ;;  %s120_s22 = int_to_ptr.hbm [resolvable:$true] %s119_s22 }
   0xd   :  { %v72_v7 = vshrl.u32 %v71_v5, 7  ;;  %61 = vst.msk [vmem:[#allocation2] sm:$0x1] %vm60_vm3, %v226_v14  ;;  %141 = vset.pattern.permute.xlu1 %v227_v22  ;;  %142 = vset.pattern.permute.xlu0 %v227_v22  ;;  %s117_s19 = sshll.u32 %s228_s1, 4  ;;  %s118_s19 = int_to_ptr.vmem [resolvable:$true] %s117_s19 }
   0xe   :  { %v66_v3 = vsel %vm65_vm0, %v64_v2, 0.0 }
   0xf   :  { %67 = vadd.xlane.f32.xlu0 %v66_v3  ;;  %vm76_vm1 = vcmp.eq.s32.totalorder %v72_v7, 7 }
  0x14   :  { %v85_v23 = vld [vmem:[#allocation2] sm:$0x1] }
  0x82   :  { %v68_v4 = vpop.xlane.xlu0 %67 }
  0x83   :  { %v78_v6 = vmul.f32 1.442695, %v68_v4  ;;  %v81_v8 = vmul.f32 5.0, %v68_v4  ;;  %v83_v11 = vsel %vm76_vm1, %v68_v4, 0.0 }
  0x85   :  { %144 = vpow2.f32 %v78_v6 }
  0x8b   :  { %v145_v9 = vpop.eup %144 }
  0x8c   :  { %v82_v10 = vadd.f32 %v145_v9, %v81_v8 }
  0x8e   :  { %v84_v12 = vadd.f32 %v83_v11, %v82_v10 }
  0x90   :  { %v87_v13 = vsel %vm86_vm2, %v84_v12, 0.0 }
  0x91   :  { %88 = vadd.xlane.f32.xlu0 %v87_v13 }
 0x104   :  { %v89_v15 = vpop.xlane.xlu0 %88 }
 0x105   :  { %v90_v16 = vrot.slane %v89_v15, 4 }
 0x107   :  { %v91_v17 = vadd.f32 %v90_v16, %v89_v15 }
 0x109   :  { %v92_v18 = vrot.slane %v91_v17, 2 }
 0x10b   :  { %v93_v19 = vadd.f32 %v92_v18, %v91_v17 }
 0x10d   :  { %v94_v20 = vrot.slane %v93_v19, 1 }
 0x10f   :  { %v95_v21 = vadd.f32 %v94_v20, %v93_v19 }
 0x111   :  { %134 = vpush %v95_v21 }
 0x142   :  { %s135_s0 = spop %134 }
 0x143   :  { %v97_v24 = vstv %s135_s0 }
 0x144   :  { %v98_v25 = vadd.f32 %v97_v24, %v85_v23 }
 0x146   :  { %100 = vst.msk [vmem:[#allocation2] sm:$0x1] %vm60_vm3, %v98_v25 }
 0x14d   :  { %v143_v26 = vld [vmem:[#allocation2] ss:$0 sm:$0xff] }
 0x14e   :  { %108 = vperm.xlu1 %141, %v143_v26  }
 0x1c0   :  { %v109_v27 = vpop.permute.xlu1 %108 }
 0x1c1   :  { %111 = vst [vmem:[#allocation8] sm:$0xff] %v109_v27 }
 0x1c2   :  { %122 = dma.vmem_to_hbm [thread:$0]  %s118_s19, 128, %s120_s22, [#allocation5]  }
 0x1c3   :  { %222 = dma.done.wait [#allocation5], 128  }
 0x1c4   :  { %223 = vsyncadd [#allocation5], 4294967168 }
 0x1c5   :  { %127 = vsyncpa [#allocation4], 1 }
 0x1c6   :  { %128 = vsyncpa [#allocation7], 1 }
 0x1c7   :  { %129 = vsyncpa [#allocation5], 1 }

</bundles_post_ra>
